<compile_context>
chip_gen: v6e
topology: v6e:2x2x1
jax: 0.10.0
libtpu: 0.0.40
codegen_flags: <defaults>
</compile_context>

<pallas_src>
import jax
import jax.numpy as jnp
from jax.experimental import pallas as pl
from jax.experimental.pallas import tpu as pltpu

HIDDEN = 32
_LANE = 128


def _round_up(x, m):
    return ((x + m - 1) // m) * m


def _critic_kernel(state_ref, action_ref, w1s_ref, w1a_ref, b1_ref,
                   w2_ref, b2_ref, w3_ref, b3_ref, o_ref):
    # state_ref:(S,TB) bf16   action_ref:(A,TB) bf16      (batch on lanes)
    # w1s_ref:(32,S) bf16     w1a_ref:(32,A) bf16         b1_ref:(32,1) f32
    # w2_ref:(32,32) bf16     b2_ref:(32,1) f32
    # w3_ref:(32,1) f32       b3_ref:(1,1) f32 (SMEM)
    # o_ref:(1,TB) f32        (lane-dense output row)
    s = state_ref[...]
    a = action_ref[...]

    # Layer 1: fused concat == sum of two matmuls (K = S and K = A), f32 acc.
    h1 = (jnp.dot(w1s_ref[...], s, preferred_element_type=jnp.float32)
          + jnp.dot(w1a_ref[...], a, preferred_element_type=jnp.float32)
          + b1_ref[...])                       # (32, TB) f32
    h1 = jnp.maximum(h1, 0.0)

    # Layer 2.
    h2 = jnp.dot(w2_ref[...], h1.astype(w2_ref.dtype),
                 preferred_element_type=jnp.float32) + b2_ref[...]
    h2 = jnp.maximum(h2, 0.0)                  # (32, TB) f32

    # Layer 3 (out_features == 1): VPU multiply + sublane reduction, scalar
    # bias from SMEM.  Result is a lane-dense (1, TB) row -> unmasked stores.
    q = jnp.sum(h2 * w3_ref[...], axis=0, keepdims=True) + b3_ref[0, 0]
    o_ref[...] = q.astype(o_ref.dtype)


def _pick_tile(batch, tile_b):
    """Choose a lane-aligned batch tile and the padded batch extent."""
    tile_b = int(max(_LANE, min(int(tile_b), 32768)))   # ~<1 KB VMEM per column
    if batch > tile_b:
        tile = (tile_b // _LANE) * _LANE       # multiple of 128 -> grid >= 2 steps
    elif batch >= 2 * _LANE and batch % (2 * _LANE) == 0:
        tile = batch // 2                      # two steps so v7x uses both TCs
    else:
        tile = batch                           # single full-extent block (legal)
    return tile, _round_up(batch, tile)


def critic_forward(state, action, params, *, tile_b=4096):
    """state: (B, state_dim) f32, action: (B, action_dim) f32 -> (B, 1) f32."""
    w1, b1, w2, b2, w3, b3 = params            # PyTorch (out, in) layout
    B, S = state.shape
    A = action.shape[1]
    assert w1.shape == (HIDDEN, S + A)

    tile, b_pad = _pick_tile(B, tile_b)
    pad = b_pad - B

    # One fused wrapper pass per input: transpose (B,F)->(F,B), cast to bf16
    # and (only if ragged) zero-pad the lane axis.  XLA fuses these into a
    # single read-f32/write-bf16 op — no standalone cast or pad pass.
    def to_feature_major(x):
        xt = x.T.astype(jnp.bfloat16)
        if pad:
            xt = jnp.pad(xt, ((0, 0), (0, pad)))
        return xt

    state_t = to_feature_major(state)          # (S, b_pad) bf16
    action_t = to_feature_major(action)        # (A, b_pad) bf16

    # Weights: (out, in) is already what feature-major math needs (tiny arrays).
    w1s = w1[:, :S].astype(jnp.bfloat16)                 # (32, S)
    w1a = w1[:, S:].astype(jnp.bfloat16)                 # (32, A)
    b1c = b1.reshape(HIDDEN, 1).astype(jnp.float32)      # (32, 1)
    w2c = w2.astype(jnp.bfloat16)                        # (32, 32)
    b2c = b2.reshape(HIDDEN, 1).astype(jnp.float32)      # (32, 1)
    w3c = w3.reshape(HIDDEN, 1).astype(jnp.float32)      # (32, 1) column of W3
    b3c = b3.reshape(1, 1).astype(jnp.float32)           # (1, 1) -> SMEM

    grid = (b_pad // tile,)

    def batch_spec(rows):
        return pl.BlockSpec((rows, tile), lambda i: (0, i))

    def const_spec(shape):
        # Constant block index -> DMA'd once, resident in VMEM across grid steps.
        return pl.BlockSpec(shape, lambda i: (0, 0))

    q_pad = pl.pallas_call(
        _critic_kernel,
        out_shape=jax.ShapeDtypeStruct((1, b_pad), jnp.float32),
        grid=grid,
        in_specs=[
            batch_spec(S),                                       # state  (S, tile)
            batch_spec(A),                                       # action (A, tile)
            const_spec((HIDDEN, S)),                             # W1_state
            const_spec((HIDDEN, A)),                             # W1_action
            const_spec((HIDDEN, 1)),                             # b1
            const_spec((HIDDEN, HIDDEN)),                        # W2
            const_spec((HIDDEN, 1)),                             # b2
            const_spec((HIDDEN, 1)),                             # W3 (column)
            pl.BlockSpec(memory_space=pltpu.MemorySpace.SMEM),   # b3 scalar
        ],
        out_specs=batch_spec(1),                                 # (1, tile) lane-dense
        compiler_params=pltpu.CompilerParams(
            dimension_semantics=("parallel",),        # shard batch over TCs (v7x)
            vmem_limit_bytes=64 * 1024 * 1024,        # <= physical on v5e/v6e/v7x
        ),
    )(state_t, action_t, w1s, w1a, b1c, w2c, b2c, w3c, b3c)

    return q_pad[0, :B][:, None]                 # (B, 1)


def init_params(key, state_dim, action_dim):
    """nn.Linear-style uniform(-1/sqrt(fan_in), 1/sqrt(fan_in)) init, PyTorch
    (out, in) weight layout: (W1 (32,S+A), b1 (32,), W2 (32,32), b2 (32,),
    W3 (1,32), b3 (1,))."""
    def linear(k, fan_in, fan_out):
        kw, kb = jax.random.split(k)
        bound = 1.0 / (fan_in ** 0.5)
        w = jax.random.uniform(kw, (fan_out, fan_in), jnp.float32, -bound, bound)
        b = jax.random.uniform(kb, (fan_out,), jnp.float32, -bound, bound)
        return w, b

    k1, k2, k3 = jax.random.split(key, 3)
    w1, b1 = linear(k1, state_dim + action_dim, HIDDEN)
    w2, b2 = linear(k2, HIDDEN, HIDDEN)
    w3, b3 = linear(k3, HIDDEN, 1)
    return (w1, b1, w2, b2, w3, b3)


def _reference_forward(state, action, params, *, mirror_kernel_dtypes=True):
    """Pure-JAX reference.  mirror_kernel_dtypes=True applies the same bf16
    casts / feature-major split as the kernel (tight check); False is the
    exact f32 PyTorch-equivalent forward (loose check)."""
    w1, b1, w2, b2, w3, b3 = params
    S = state.shape[1]
    if mirror_kernel_dtypes:
        s_t = state.T.astype(jnp.bfloat16)
        a_t = action.T.astype(jnp.bfloat16)
        h1 = (jnp.dot(w1[:, :S].astype(jnp.bfloat16), s_t,
                      preferred_element_type=jnp.float32)
              + jnp.dot(w1[:, S:].astype(jnp.bfloat16), a_t,
                        preferred_element_type=jnp.float32)
              + b1[:, None])
        h1 = jnp.maximum(h1, 0.0)
        h2 = jnp.dot(w2.astype(jnp.bfloat16), h1.astype(jnp.bfloat16),
                     preferred_element_type=jnp.float32) + b2[:, None]
        h2 = jnp.maximum(h2, 0.0)
        q = jnp.sum(h2 * w3.reshape(HIDDEN, 1), axis=0) + b3[0]
        return q[:, None]
    x = jnp.concatenate([state, action], axis=1)
    h1 = jnp.maximum(x @ w1.T + b1, 0.0)
    h2 = jnp.maximum(h1 @ w2.T + b2, 0.0)
    return h2 @ w3.T + b3


if __name__ == "__main__":
    state_dim, action_dim, batch = 8, 4, 40

    key = jax.random.PRNGKey(0)
    key, ks, ka, kp = jax.random.split(key, 4)
    state = jax.random.normal(ks, (batch, state_dim), jnp.float32)
    action = jax.random.normal(ka, (batch, action_dim), jnp.float32)
    params = init_params(kp, state_dim, action_dim)

    # Path 1: small batch -> single full-extent block (lane dim == array dim).
    q = critic_forward(state, action, params)
    jax.block_until_ready(q)
    assert q.shape == (batch, 1)

    # Tight check vs a reference mirroring the kernel's bf16 casts.
    q_mirror = _reference_forward(state, action, params, mirror_kernel_dtypes=True)
    assert jnp.allclose(q, q_mirror, atol=1e-4, rtol=1e-4), \
        float(jnp.max(jnp.abs(q - q_mirror)))

    # Loose sanity check vs the exact f32 PyTorch-equivalent forward.
    q_f32 = _reference_forward(state, action, params, mirror_kernel_dtypes=False)
    assert jnp.allclose(q, q_f32, atol=5e-2, rtol=5e-2), \
        float(jnp.max(jnp.abs(q - q_f32)))

    # Path 2: multi-step, lane-aligned grid with a ragged batch (B=300 ->
    # b_pad=384, three 128-column tiles, zero-padded tail sliced off).
    batch2 = 300
    key, ks2, ka2 = jax.random.split(key, 3)
    state2 = jax.random.normal(ks2, (batch2, state_dim), jnp.float32)
    action2 = jax.random.normal(ka2, (batch2, action_dim), jnp.float32)
    q2 = critic_forward(state2, action2, params, tile_b=128)
    jax.block_until_ready(q2)
    assert q2.shape == (batch2, 1)
    q2_ref = _reference_forward(state2, action2, params, mirror_kernel_dtypes=True)
    assert jnp.allclose(q2, q2_ref, atol=1e-4, rtol=1e-4), \
        float(jnp.max(jnp.abs(q2 - q2_ref)))

    print("KERNEL_OK")
</pallas_src>

<mosaic_0001>
module attributes {stable_mosaic.version = 11 : i64} {
  func.func @_critic_kernel(%arg0: i32, %arg1: memref<8x40xbf16, #tpu.memory_space<vmem>>, %arg2: memref<4x40xbf16, #tpu.memory_space<vmem>>, %arg3: memref<32x8xbf16, #tpu.memory_space<vmem>>, %arg4: memref<32x4xbf16, #tpu.memory_space<vmem>>, %arg5: memref<32x1xf32, #tpu.memory_space<vmem>>, %arg6: memref<32x32xbf16, #tpu.memory_space<vmem>>, %arg7: memref<32x1xf32, #tpu.memory_space<vmem>>, %arg8: memref<32x1xf32, #tpu.memory_space<vmem>>, %arg9: memref<1x1xf32, #tpu.memory_space<smem>>, %arg10: memref<1x40xf32, #tpu.memory_space<vmem>>) attributes {dimension_semantics = [#tpu.dimension_semantics<parallel>], iteration_bounds = array<i64: 1>, scalar_prefetch = 0 : i64, scratch_operands = 0 : i64, tpu.core_type = #tpu.core_type<tc>, window_params = [{transform_indices = @transform_0, window_bounds = array<i64: 8, 40>}, {transform_indices = @transform_1, window_bounds = array<i64: 4, 40>}, {pipeline_mode = #tpu.pipeline_mode<synchronous>, transform_indices = @transform_2, window_bounds = array<i64: 32, 8>}, {pipeline_mode = #tpu.pipeline_mode<synchronous>, transform_indices = @transform_3, window_bounds = array<i64: 32, 4>}, {pipeline_mode = #tpu.pipeline_mode<synchronous>, transform_indices = @transform_4, window_bounds = array<i64: 32, 1>}, {pipeline_mode = #tpu.pipeline_mode<synchronous>, transform_indices = @transform_5, window_bounds = array<i64: 32, 32>}, {pipeline_mode = #tpu.pipeline_mode<synchronous>, transform_indices = @transform_6, window_bounds = array<i64: 32, 1>}, {pipeline_mode = #tpu.pipeline_mode<synchronous>, transform_indices = @transform_7, window_bounds = array<i64: 32, 1>}, {transform_indices = @transform_8, window_bounds = array<i64: 1, 1>}, {transform_indices = @transform_9, window_bounds = array<i64: 1, 40>}]} {
    %c0 = arith.constant 0 : index
    %c0_0 = arith.constant 0 : index
    %0 = vector.load %arg1[%c0, %c0_0] : memref<8x40xbf16, #tpu.memory_space<vmem>>, vector<8x40xbf16>
    %c0_1 = arith.constant 0 : index
    %c0_2 = arith.constant 0 : index
    %1 = vector.load %arg2[%c0_1, %c0_2] : memref<4x40xbf16, #tpu.memory_space<vmem>>, vector<4x40xbf16>
    %c0_3 = arith.constant 0 : index
    %c0_4 = arith.constant 0 : index
    %2 = vector.load %arg3[%c0_3, %c0_4] : memref<32x8xbf16, #tpu.memory_space<vmem>>, vector<32x8xbf16>
    %cst = arith.constant dense<0.000000e+00> : vector<32x40xf32>
    %3 = tpu.matmul %2, %0, %cst {dimension_numbers = #tpu.dot_dimension_numbers<[1], [0], [0], [1], [0, 0, 1, 1], [], []>} : vector<32x8xbf16>, vector<8x40xbf16>, vector<32x40xf32> -> vector<32x40xf32>
    %c0_5 = arith.constant 0 : index
    %c0_6 = arith.constant 0 : index
    %4 = vector.load %arg4[%c0_5, %c0_6] : memref<32x4xbf16, #tpu.memory_space<vmem>>, vector<32x4xbf16>
    %cst_7 = arith.constant dense<0.000000e+00> : vector<32x40xf32>
    %5 = tpu.matmul %4, %1, %cst_7 {dimension_numbers = #tpu.dot_dimension_numbers<[1], [0], [0], [1], [0, 0, 1, 1], [], []>} : vector<32x4xbf16>, vector<4x40xbf16>, vector<32x40xf32> -> vector<32x40xf32>
    %6 = arith.addf %3, %5 : vector<32x40xf32>
    %c0_8 = arith.constant 0 : index
    %c0_9 = arith.constant 0 : index
    %7 = vector.load %arg5[%c0_8, %c0_9] : memref<32x1xf32, #tpu.memory_space<vmem>>, vector<32x1xf32>
    %8 = vector.broadcast %7 : vector<32x1xf32> to vector<32x40xf32>
    %9 = arith.addf %6, %8 : vector<32x40xf32>
    %cst_10 = arith.constant 0.000000e+00 : f32
    %10 = vector.broadcast %cst_10 : f32 to vector<32x40xf32>
    %11 = arith.maximumf %9, %10 : vector<32x40xf32>
    %c0_11 = arith.constant 0 : index
    %c0_12 = arith.constant 0 : index
    %12 = vector.load %arg6[%c0_11, %c0_12] : memref<32x32xbf16, #tpu.memory_space<vmem>>, vector<32x32xbf16>
    %13 = arith.truncf %11 : vector<32x40xf32> to vector<32x40xbf16>
    %cst_13 = arith.constant dense<0.000000e+00> : vector<32x40xf32>
    %14 = tpu.matmul %12, %13, %cst_13 {dimension_numbers = #tpu.dot_dimension_numbers<[1], [0], [0], [1], [0, 0, 1, 1], [], []>} : vector<32x32xbf16>, vector<32x40xbf16>, vector<32x40xf32> -> vector<32x40xf32>
    %c0_14 = arith.constant 0 : index
    %c0_15 = arith.constant 0 : index
    %15 = vector.load %arg7[%c0_14, %c0_15] : memref<32x1xf32, #tpu.memory_space<vmem>>, vector<32x1xf32>
    %16 = vector.broadcast %15 : vector<32x1xf32> to vector<32x40xf32>
    %17 = arith.addf %14, %16 : vector<32x40xf32>
    %cst_16 = arith.constant 0.000000e+00 : f32
    %18 = vector.broadcast %cst_16 : f32 to vector<32x40xf32>
    %19 = arith.maximumf %17, %18 : vector<32x40xf32>
    %c0_17 = arith.constant 0 : index
    %c0_18 = arith.constant 0 : index
    %20 = vector.load %arg8[%c0_17, %c0_18] : memref<32x1xf32, #tpu.memory_space<vmem>>, vector<32x1xf32>
    %21 = vector.broadcast %20 : vector<32x1xf32> to vector<32x40xf32>
    %22 = arith.mulf %19, %21 : vector<32x40xf32>
    %cst_19 = arith.constant dense<0.000000e+00> : vector<40xf32>
    %23 = vector.multi_reduction <add>, %22, %cst_19 [0] : vector<32x40xf32> to vector<40xf32>
    %24 = vector.shape_cast %23 : vector<40xf32> to vector<1x40xf32>
    %c0_20 = arith.constant 0 : index
    %c0_21 = arith.constant 0 : index
    %25 = memref.load %arg9[%c0_20, %c0_21] : memref<1x1xf32, #tpu.memory_space<smem>>
    %26 = vector.broadcast %25 : f32 to vector<1x40xf32>
    %27 = arith.addf %24, %26 : vector<1x40xf32>
    %c0_22 = arith.constant 0 : index
    %c0_23 = arith.constant 0 : index
    %28 = vector.load %arg10[%c0_22, %c0_23] : memref<1x40xf32, #tpu.memory_space<vmem>>, vector<1x40xf32>
    tpu.vector_store %arg10[%c0_22, %c0_23], %27 {strides = array<i32>} : memref<1x40xf32, #tpu.memory_space<vmem>>, vector<1x40xf32>,
    return
  }
  func.func @transform_0(%arg0: i32) -> (i32, i32) {
    %c0_i32 = arith.constant 0 : i32
    %c0_i32_0 = arith.constant 0 : i32
    return %c0_i32, %arg0 : i32, i32
  }
  func.func @transform_1(%arg0: i32) -> (i32, i32) {
    %c0_i32 = arith.constant 0 : i32
    %c0_i32_0 = arith.constant 0 : i32
    return %c0_i32, %arg0 : i32, i32
  }
  func.func @transform_2(%arg0: i32) -> (i32, i32) {
    %c0_i32 = arith.constant 0 : i32
    %c0_i32_0 = arith.constant 0 : i32
    %c0_i32_1 = arith.constant 0 : i32
    return %c0_i32, %c0_i32_0 : i32, i32
  }
  func.func @transform_3(%arg0: i32) -> (i32, i32) {
    %c0_i32 = arith.constant 0 : i32
    %c0_i32_0 = arith.constant 0 : i32
    %c0_i32_1 = arith.constant 0 : i32
    return %c0_i32, %c0_i32_0 : i32, i32
  }
  func.func @transform_4(%arg0: i32) -> (i32, i32) {
    %c0_i32 = arith.constant 0 : i32
    %c0_i32_0 = arith.constant 0 : i32
    %c0_i32_1 = arith.constant 0 : i32
    return %c0_i32, %c0_i32_0 : i32, i32
  }
  func.func @transform_5(%arg0: i32) -> (i32, i32) {
    %c0_i32 = arith.constant 0 : i32
    %c0_i32_0 = arith.constant 0 : i32
    %c0_i32_1 = arith.constant 0 : i32
    return %c0_i32, %c0_i32_0 : i32, i32
  }
  func.func @transform_6(%arg0: i32) -> (i32, i32) {
    %c0_i32 = arith.constant 0 : i32
    %c0_i32_0 = arith.constant 0 : i32
    %c0_i32_1 = arith.constant 0 : i32
    return %c0_i32, %c0_i32_0 : i32, i32
  }
  func.func @transform_7(%arg0: i32) -> (i32, i32) {
    %c0_i32 = arith.constant 0 : i32
    %c0_i32_0 = arith.constant 0 : i32
    %c0_i32_1 = arith.constant 0 : i32
    return %c0_i32, %c0_i32_0 : i32, i32
  }
  func.func @transform_8(%arg0: i32) -> (i32, i32) {
    %c0_i32 = arith.constant 0 : i32
    %c0_i32_0 = arith.constant 0 : i32
    %c0_i32_1 = arith.constant 0 : i32
    return %c0_i32, %c0_i32_0 : i32, i32
  }
  func.func @transform_9(%arg0: i32) -> (i32, i32) {
    %c0_i32 = arith.constant 0 : i32
    %c0_i32_0 = arith.constant 0 : i32
    return %c0_i32, %arg0 : i32, i32
  }
}

</mosaic_0001>

<bundles_post_ra>
// kernel: tpu_custom_call.1
= control target key start
LH: loop header
LB: loop body
LE: loop exit
PB: predicated region body
PF: predicated region fallthrough
CT: control target
= control target key end

     0   :  { %vm62_vm0 = vcmask 1041408   ;;  %vm132_vm1 = vcmask 1043456   ;;  %vm55_vm2 = vcmask 31744   ;;  %vm125_vm3 = vcmask 64512   ;;  %s574_s0 = inlined_call_operand.vmem [shape: bf16[8,40], index: 0, kind: input, shape index: {}]   ;;  %s575_s1 = inlined_call_operand.vmem [shape: bf16[4,40], index: 1, kind: input, shape index: {}]   ;;  %s576_s2 = inlined_call_operand.vmem [shape: bf16[32,8], index: 2, kind: input, shape index: {}]   ;;  %s577_s3 = inlined_call_operand.vmem [shape: bf16[32,4], index: 3, kind: input, shape index: {}]   ;;  %s578_s4 = inlined_call_operand.vmem [shape: f32[32,1], index: 4, kind: input, shape index: {}]   ;;  %s579_s5 = inlined_call_operand.vmem [shape: bf16[32,32], index: 5, kind: input, shape index: {}]   ;;  %s580_s6 = inlined_call_operand.vmem [shape: f32[32,1], index: 6, kind: input, shape index: {}]   ;;  %s581_s7 = inlined_call_operand.vmem [shape: f32[32,1], index: 7, kind: input, shape index: {}]   ;;  %s582_s8 = inlined_call_operand.<no memory space> [shape: f32[1,1], index: 8, kind: input, shape index: {}]   ;;  %s583_s9 = inlined_call_operand.hbm [shape: f32[1,40], index: 9, kind: output, shape index: {}]  }
   0x1   :  { %v36_v0 = vld [vmem:[%s575_s1] sm:$0x3]  ;;  %v428_v6 = vld [vmem:[%s577_s3 + $0x8] sm:$0xff]   ;;  %v454_v8 = vmov 0   ;;  %v187_v9 = vld [vmem:[%s578_s4 + $0x10] sm:$0xff] }
   0x2   :  { %v35_v1 = vld [vmem:[%s574_s0] sm:$0xf]  ;;  %420 = vmatprep.subr.msk.bf16.mxu0 %vm62_vm0, %v36_v0  ;;  %v64_v2 = vsel %vm62_vm0, %v36_v0, 0  ;;  %v429_v7 = vld [vmem:[%s576_s2 + $0x8] sm:$0xff]   ;;  %424 = vset.pattern.permute.xlu0 %v454_v8  ;;  %v188_v11 = vld [vmem:[%s578_s4 + $0x18] sm:$0xff] }
   0x3   :  { %421 = vmatprep.subr.msk.bf16.mxu1 %vm132_vm1, %v35_v1  ;;  %v134_v3 = vsel %vm132_vm1, %v35_v1, 0  ;;  %401 = vmatpush3.bf16.msra.mxu0 %v64_v2  ;;  %v426_v4 = vld [vmem:[%s577_s3] sm:$0xff]   ;;  %v186_v12 = vld [vmem:[%s578_s4 + $0x8] sm:$0xff] }
   0x4   :  { %407 = vmatpush3.bf16.msra.mxu1 %v134_v3  ;;  %v427_v5 = vld [vmem:[%s576_s2] sm:$0xff]   ;;  %402 = vmatprep.mubr.msk.bf16.mxu0 %vm55_vm2, %v426_v4 }
   0x5   :  { %408 = vmatprep.mubr.msk.bf16.mxu1 %vm125_vm3, %v427_v5  ;;  %201 = vperm.xlu0 %424, %v187_v9   ;;  %v185_v10 = vld [vmem:[%s578_s4] sm:$0xff] }
   0x6   :  { %403 = vmatmul.mubr.msk.bf16.vlgmr.msra.gmra.mxu0 %vm55_vm2, %v428_v6  ;;  %425 = vset.pattern.permute.xlu1 %v454_v8 }
   0x7   :  { %409 = vmatmul.mubr.msk.bf16.vlgmr.msra.gmra.mxu1 %vm125_vm3, %v429_v7  ;;  %191 = vperm.xlu1 %425, %v185_v10  }
   0x9   :  { %206 = vperm.xlu0 %424, %v188_v11  }
   0xa   :  { %15 = vsyncpa [#allocation4], 0  ;;  %v223_v13 = vld [vmem:[%s580_s6] sm:$0xff]  ;;  %v224_v14 = vld [vmem:[%s580_s6 + $0x8] sm:$0xff]  ;;  %vm257_vm4 = vcmask 261120   ;;  %vm345_vm5 = vcmask 326656  }
   0xb   :  { %196 = vperm.xlu1 %425, %v186_v12   ;;  %v225_v15 = vld [vmem:[%s580_s6 + $0x10] sm:$0xff]  ;;  %v226_v16 = vld [vmem:[%s580_s6 + $0x18] sm:$0xff]  ;;  %v317_v17 = vld [vmem:[%s581_s7] sm:$0xff]  ;;  %s455_s20 = smov [#allocation3]   ;;  %vm362_vm6 = vcmask 319488  }
   0xc   :  { %v318_v18 = vld [vmem:[%s581_s7 + $0x8] sm:$0xff]  ;;  %v319_v19 = vld [vmem:[%s581_s7 + $0x10] sm:$0xff]  ;;  %v320_v20 = vld [vmem:[%s581_s7 + $0x18] sm:$0xff]  ;;  %s370_s21 = sshll.u32 %s455_s20, 4  ;;  %s371_s21 = int_to_ptr.vmem [resolvable:$true] %s370_s21 }
   0xd   :  { %229 = vperm.xlu0 %424, %v223_v13   ;;  %v430_v21 = vld [vmem:[%s579_s5] sm:$0xff]   ;;  %v431_v48 = vld [vmem:[%s579_s5 + $0x8] sm:$0xff]   ;;  %s432_s22 = scalar_lea.vmem %s371_s21, 16  ;;  %s436_s3 = scalar_lea.vmem %s371_s21, 32 }
   0xe   :  { %416 = vmatprep.mubr.msk.bf16.mxu0 %vm257_vm4, %v430_v21  ;;  %v360_v21 = vstv %s582_s8  ;;  %p433_p0 = scmp.ne.s32.totalorder %s371_s21, %s432_s22  ;;  %p437_p1 = scmp.lt.s32.totalorder %s371_s21, %s371_s21 }
   0xf   :  { %234 = vperm.xlu1 %425, %v224_v14   ;;  %p438_p2 = scmp.lt.s32.totalorder %s436_s3, %s432_s22 }
  0x11   :  { %239 = vperm.xlu0 %424, %v225_v15   ;;  %p439_p3 = por %p438_p2, %p437_p1 }
  0x13   :  { %244 = vperm.xlu1 %425, %v226_v16   ;;  %p440_p4 = pnand %p439_p3, %p433_p0 }
  0x15   :  { %323 = vperm.xlu0 %424, %v317_v17  }
  0x17   :  { %328 = vperm.xlu1 %425, %v318_v18  }
  0x19   :  { %333 = vperm.xlu0 %424, %v319_v19  }
  0x1b   :  { %338 = vperm.xlu1 %425, %v320_v20  }
  0x80   :  { %v202_v23 = vpop.permute.xlu0 %201 }
  0x82   :  { %v192_v27 = vpop.permute.xlu1 %191 }
  0x84   :  { %v207_v35 = vpop.permute.xlu0 %206 }
  0x86   :  { %v197_v40 = vpop.permute.xlu1 %196 }
  0x88   :  { %v230_v49 = vpop.permute.xlu0 %229 }
  0x8a   :  { %v235_v50 = vpop.permute.xlu1 %234 }
  0x8c   :  { %v240_v51 = vpop.permute.xlu0 %239 }
  0x8e   :  { %v245_v52 = vpop.permute.xlu1 %244 }
  0x90   :  { %v324_v57 = vpop.permute.xlu0 %323 }
  0x92   :  { %v329_v61 = vpop.permute.xlu1 %328 }
  0x94   :  { %v334_v4 = vpop.permute.xlu0 %333 }
  0x96   :  { %v339_v7 = vpop.permute.xlu1 %338 }
  0xc6   :  { %v404_v22 = vpop.f32.mrf.mxu0 }
  0xc7   :  { %v410_v24 = vpop.f32.mrf.mxu1 }
  0xc8   :  { %v179_v25 = vadd.f32 %v410_v24, %v404_v22  ;;  %v100_v26 = vpop.f32.mrf.mxu0 }
  0xc9   :  { %v170_v28 = vpop.f32.mrf.mxu1 }
  0xca   :  { %v171_v29 = vadd.f32 %v170_v28, %v100_v26  ;;  %v405_v30 = vpop.f32.mrf.mxu0  ;;  %v211_v32 = vadd.f32 %v202_v23, %v179_v25 }
  0xcb   :  { %v411_v31 = vpop.f32.mrf.mxu1 }
  0xcc   :  { %v182_v33 = vadd.f32 %v411_v31, %v405_v30  ;;  %v103_v34 = vpop.f32.mrf.mxu0  ;;  %v209_v37 = vadd.f32 %v192_v27, %v171_v29  ;;  %v215_v41 = vmax.f32 %v211_v32, 0.0 }
  0xcd   :  { %v173_v36 = vpop.f32.mrf.mxu1 }
  0xce   :  { %v212_v38 = vadd.f32 %v207_v35, %v182_v33  ;;  %v174_v39 = vadd.f32 %v173_v36, %v103_v34  ;;  %v213_v44 = vmax.f32 %v209_v37, 0.0 }
  0xd0   :  { %v216_v42 = vmax.f32 %v212_v38, 0.0  ;;  %v210_v43 = vadd.f32 %v197_v40, %v174_v39 }
  0xd2   :  { %v214_v45 = vmax.f32 %v210_v43, 0.0  ;;  %v222_v46 = vpack.c.bf16 %v216_v42, %v215_v41 }
  0xd4   :  { %412 = vmatprep.subr.bf16.mxu0 %v222_v46  ;;  %v221_v47 = vpack.c.bf16 %v214_v45, %v213_v44 }
  0xd5   :  { %413 = vmatpush3.bf16.msra.mxu0 %v222_v46 }
  0xd6   :  { %414 = vmatprep.subr.bf16.mxu0 %v221_v47 }
  0xd9   :  { %415 = vmatpush3.bf16.msra.mxu0 %v221_v47 }
  0xdc   :  { %417 = vmatmul.mubr.msk.bf16.vlgmr.msra.gmra.mxu0 %vm257_vm4, %v431_v48 }
 0x19c   :  { %v418_v53 = vpop.f32.mrf.mxu0 }
 0x19d   :  { %v307_v55 = vadd.f32 %v418_v53, %v240_v51 }
 0x19e   :  { %v298_v54 = vpop.f32.mrf.mxu0 }
 0x19f   :  { %v299_v56 = vadd.f32 %v298_v54, %v230_v49  ;;  %v315_v63 = vmax.f32 %v307_v55, 0.0 }
 0x1a0   :  { %v419_v58 = vpop.f32.mrf.mxu0 }
 0x1a1   :  { %v313_v59 = vmax.f32 %v299_v56, 0.0  ;;  %v310_v60 = vadd.f32 %v419_v58, %v245_v52  ;;  %v343_v5 = vmul.f32 %v334_v4, %v315_v63 }
 0x1a2   :  { %v301_v62 = vpop.f32.mrf.mxu0 }
 0x1a3   :  { %v302_v0 = vadd.f32 %v301_v62, %v235_v50  ;;  %v341_v1 = vmul.f32 %v324_v57, %v313_v59  ;;  %v316_v2 = vmax.f32 %v310_v60, 0.0  ;;  %v349_v12 = vsel %vm345_vm5, %v343_v5, 0.0 }
 0x1a5   :  { %v314_v3 = vmax.f32 %v302_v0, 0.0  ;;  %v346_v8 = vsel %vm345_vm5, %v341_v1, 0.0  ;;  %v344_v9 = vmul.f32 %v339_v7, %v316_v2 }
 0x1a7   :  { %v342_v6 = vmul.f32 %v329_v61, %v314_v3  ;;  %v351_v14 = vsel %vm345_vm5, %v344_v9, 0.0 }
 0x1a9   :  { %v347_v10 = vsel %vm345_vm5, %v342_v6, 0.0 }
 0x1aa   :  { %v348_v11 = vadd.f32 %v347_v10, %v346_v8 }
 0x1ac   :  { %v350_v13 = vadd.f32 %v349_v12, %v348_v11 }
 0x1ae   :  { %v352_v15 = vadd.f32 %v351_v14, %v350_v13 }
 0x1b0   :  { %v353_v16 = vrot.slane %v352_v15, 4 }
 0x1b2   :  { %v354_v17 = vadd.f32 %v353_v16, %v352_v15 }
 0x1b4   :  { %v355_v18 = vrot.slane %v354_v17, 2 }
 0x1b6   :  { %v356_v19 = vadd.f32 %v355_v18, %v354_v17 }
 0x1b8   :  { %v357_v20 = vrot.slane %v356_v19, 1 }
 0x1ba   :  { %v358_v22 = vadd.f32 %v357_v20, %v356_v19 }
 0x1bc   :  { %v361_v23 = vadd.f32 %v360_v21, %v358_v22 }
 0x1be   :  { %363 = vst.msk [vmem:[#allocation3] sm:$0x1] %vm362_vm6, %v361_v23 }
 0x1bf   :  { %443 = shalt.err (!%p440_p4)
}
 0x1c0   :  { %373 = dma.vmem_to_hbm [thread:$0]  %s371_s21, 16, %s583_s9, [#allocation4]  }
 0x1c1   :  { %452 = dma.done.wait [#allocation4], 16  }
 0x1c2   :  { %453 = vsyncadd [#allocation4], 4294967280 }
 0x1c3   :  { %377 = vsyncpa [#allocation4], 1 }

</bundles_post_ra>
